<compile_context>
chip_gen: v7x
topology: tpu7x:2x2x1
jax: 0.10.0
libtpu: 0.0.40
codegen_flags: <defaults>
</compile_context>

<pallas_src>
import math
import jax
import jax.numpy as jnp
from jax.experimental import pallas as pl
from jax.experimental.pallas import tpu as pltpu


# -----------------------------------------------------------------------------
# Pallas kernel
# -----------------------------------------------------------------------------
def _layer_norm(h, g, b, eps=1e-5):
    mu = jnp.mean(h, axis=-1, keepdims=True)
    var = jnp.mean((h - mu) ** 2, axis=-1, keepdims=True)
    return (h - mu) * jax.lax.rsqrt(var + eps) * g + b


def decoder_last_token_kernel(lens_ref,   # SMEM (B,) int32   valid lengths (scalar prefetch)
                              x_ref,      # (B*S, D) f32      all token embeddings
                              wqkv_ref,   # (D, 3D)  bf16     fused [K | V | Q/sqrt(D)]
                              wo_ref,     # (D, D)   bf16
                              w1_ref,     # (D, F)   bf16
                              w2_ref,     # (F, D)   bf16
                              g1_ref, b1_ref, g2_ref, b2_ref,  # (1, D) f32
                              act_ref,    # (B, D)   f32      last-token hidden state
                              q_scratch): # (B*S, D) f32      staging for strided q gather
    f32, bf16 = jnp.float32, jnp.bfloat16
    BS, D = x_ref.shape
    B = act_ref.shape[0]
    S = BS // B

    # ---- one pre-LN + one fused QKV matmul over all B*S token rows -----------
    h_all = _layer_norm(x_ref[...], g1_ref[...], b1_ref[...])            # f32 (BS, D)
    qkv = jnp.dot(h_all.astype(bf16), wqkv_ref[...],
                  preferred_element_type=f32)                            # f32 (BS, 3D)
    k_all = qkv[:, :D]                                                   # (BS, D)
    v_all = qkv[:, D:2 * D]                                              # (BS, D)
    # last-token queries (rows S-1, 2S-1, ...) via a strided sublane read; the
    # 1/sqrt(D) scale is already folded into the Q weight columns.
    q_scratch[...] = qkv[:, 2 * D:]
    q = q_scratch[pl.ds(S - 1, B, stride=S), :]                          # f32 (B, D)

    # ---- attention of each batch's last token over its own valid keys --------
    scores = jax.lax.dot_general(
        q.astype(bf16), k_all.astype(bf16),
        dimension_numbers=(((1,), (1,)), ((), ())),
        preferred_element_type=f32)                                      # (B, BS)
    col = jax.lax.broadcasted_iota(jnp.int32, (B, BS), 1)
    row = jax.lax.broadcasted_iota(jnp.int32, (B, BS), 0)
    # Per-row valid length from SMEM scalars (O(B) selects on one tiny vreg; switch
    # to a (B, 1) VMEM vector input if B grows large).
    ends = jnp.zeros((B, BS), jnp.int32)
    for b in range(B):
        ends = jnp.where(row == b, lens_ref[b], ends)
    start = row * S
    # keep = own-batch columns within the valid prefix; causal constraint is vacuous
    # for the last-token query.
    keep = (col >= start) & (col < start + ends)
    scores = jnp.where(keep, scores, -1e9)

    # f32 softmax: max-subtract, exp, EUP reciprocal
    m = jnp.max(scores, axis=-1, keepdims=True)
    e = jnp.exp(scores - m)
    p = e * pl.reciprocal(jnp.sum(e, axis=-1, keepdims=True), approx=True)

    attn = jnp.dot(p.astype(bf16), v_all.astype(bf16),
                   preferred_element_type=f32)                           # (B, D)
    x_last = x_ref[pl.ds(S - 1, B, stride=S), :]                         # (B, D) residual
    x_mid = x_last + jnp.dot(attn.astype(bf16), wo_ref[...],
                             preferred_element_type=f32)                 # (B, D)

    # ---- MLP on the B last-token rows only ------------------------------------
    # TODO(synk): PyTorch nn.GELU defaults to exact erf; tanh-approx GELU is used here
    # (and in the reference) since erf lowering in Mosaic is not guaranteed.
    h2 = _layer_norm(x_mid, g2_ref[...], b2_ref[...])
    ff = jax.nn.gelu(jnp.dot(h2.astype(bf16), w1_ref[...],
                             preferred_element_type=f32), approximate=True)
    act_ref[...] = x_mid + jnp.dot(ff.astype(bf16), w2_ref[...],
                                   preferred_element_type=f32)


# -----------------------------------------------------------------------------
# Wrappers
# -----------------------------------------------------------------------------
_VMEM_SPEC = pl.BlockSpec(memory_space=pltpu.MemorySpace.VMEM)


def decoder_last_hidden(x_emb, lens, kp):
    """x_emb (B,S,D) f32, lens (B,) int32 -> last-token hidden (B,D) f32."""
    B, S, D = x_emb.shape
    x_flat = x_emb.reshape(B * S, D)
    grid_spec = pltpu.PrefetchScalarGridSpec(
        num_scalar_prefetch=1,          # lens -> SMEM before the kernel body runs
        grid=(1,),
        in_specs=[_VMEM_SPEC] * 9,
        out_specs=_VMEM_SPEC,
        scratch_shapes=[pltpu.VMEM((B * S, D), jnp.float32)],
    )
    return pl.pallas_call(
        decoder_last_token_kernel,
        out_shape=jax.ShapeDtypeStruct((B, D), jnp.float32),
        grid_spec=grid_spec,
        compiler_params=pltpu.CompilerParams(
            dimension_semantics=("arbitrary",),
            vmem_limit_bytes=32 * 1024 * 1024),
    )(lens, x_flat,
      kp["wqkv"], kp["wo"], kp["w1"], kp["w2"],
      kp["g1"], kp["b1"], kp["g2"], kp["b2"])


class ActorContinuousPallas:
    """JAX/Pallas port of ActorContinous: forward -> (pi=(loc, scale), actions)."""

    def __init__(self, params, log_std):
        self.params = params                       # f32 master copy
        self.log_std = log_std                     # (1, act_dim), act_dim == D
        D = params["wq"].shape[0]
        cast = lambda w: w.astype(jnp.bfloat16)    # bf16 MXU inputs (f32 accumulate)
        # Fused [K | V | Q] projection; 1/sqrt(D) folded into the Q weight columns.
        wqkv = jnp.concatenate(
            [params["wk"], params["wv"], params["wq"] * (1.0 / math.sqrt(D))], axis=1)
        self.kparams = {
            "wqkv": cast(wqkv), "wo": cast(params["wo"]),
            "w1": cast(params["w1"]), "w2": cast(params["w2"]),
            "g1": params["g1"], "b1": params["b1"],
            "g2": params["g2"], "b2": params["b2"],
        }

    def embed(self, action_ids):
        p = self.params
        S = action_ids.shape[1]
        x = jnp.take(p["tok_emb"], action_ids, axis=0) + p["pos_emb"][None, :S, :]
        return x.astype(jnp.float32)

    def forward(self, action_ids, attention_mask=None):
        B, S = action_ids.shape
        if attention_mask is None:
            lens = jnp.full((B,), S, jnp.int32)
        else:
            # TODO(synk): attention_mask is reduced to per-batch valid (prefix) lengths;
            # arbitrary non-prefix key masks are not representable in this fast path.
            lens = jnp.sum(attention_mask > 0.5, axis=-1).astype(jnp.int32)
        x_emb = self.embed(action_ids)
        actions = decoder_last_hidden(x_emb, lens, self.kparams)
        std = jnp.exp(self.log_std)[0]                    # (act_dim,)
        pi = (actions, std)                               # Normal(loc=actions, scale=std)
        return pi, actions

    def get_log_prob(self, pi, actions):
        # Plain JAX (perf review): ~B*D f32 of VPU work is far below the fixed cost of a
        # second pallas_call (dispatch + DMA + HBM round-trip of loc).
        loc, _ = pi
        log_std = self.log_std                             # (1, D)
        inv_var = jnp.exp(-2.0 * log_std)
        per_dim = (-0.5 * (actions - loc) ** 2 * inv_var
                   - log_std - 0.5 * math.log(2.0 * math.pi))
        return jnp.sum(per_dim, axis=-1)


# -----------------------------------------------------------------------------
# Pure-JAX f32 reference (correctness check only)
# -----------------------------------------------------------------------------
def reference_last_hidden(x, attention_mask, p):
    B, S, D = x.shape

    def ln(h, g, b):
        mu = jnp.mean(h, -1, keepdims=True)
        var = jnp.mean((h - mu) ** 2, -1, keepdims=True)
        return (h - mu) * jax.lax.rsqrt(var + 1e-5) * g + b

    causal = jnp.tril(jnp.ones((S, S), jnp.float32))
    allowed = causal[None, :, :] * attention_mask.astype(jnp.float32)[:, None, :]
    bias = (1.0 - allowed) * -1e9

    h = ln(x, p["g1"], p["b1"])
    q, k, v = h @ p["wq"], h @ p["wk"], h @ p["wv"]
    s = jnp.einsum("bqd,bkd->bqk", q, k) / math.sqrt(D) + bias
    a = jnp.einsum("bqk,bkd->bqd", jax.nn.softmax(s, -1), v)
    x = x + a @ p["wo"]
    h2 = ln(x, p["g2"], p["b2"])
    x = x + jax.nn.gelu(h2 @ p["w1"], approximate=True) @ p["w2"]
    return x[:, -1, :]


# -----------------------------------------------------------------------------
if __name__ == "__main__":
    B, S, D, F, V = 2, 8, 128, 256, 64   # act_dim == D (module returns raw hidden state)

    root = jax.random.PRNGKey(0)
    ks = jax.random.split(root, 10)
    init = lambda k, shape: (0.02 * jax.random.normal(k, shape)).astype(jnp.float32)

    params = {
        "tok_emb": init(ks[0], (V, D)),
        "pos_emb": init(ks[1], (S, D)),
        "wq": init(ks[2], (D, D)), "wk": init(ks[3], (D, D)),
        "wv": init(ks[4], (D, D)), "wo": init(ks[5], (D, D)),
        "w1": init(ks[6], (D, F)), "w2": init(ks[7], (F, D)),
        "g1": jnp.ones((1, D), jnp.float32), "b1": jnp.zeros((1, D), jnp.float32),
        "g2": jnp.ones((1, D), jnp.float32), "b2": jnp.zeros((1, D), jnp.float32),
    }
    log_std = -0.5 * jnp.ones((1, D), jnp.float32)   # nn.Parameter(-0.5 * ones(act_dim))

    actor = ActorContinuousPallas(params, log_std)

    action_ids = jax.random.randint(ks[8], (B, S), 0, V)
    # prefix (right-padding) attention mask: batch 0 full, batch 1 has 6 valid tokens
    attention_mask = jnp.array([[1.0] * S, [1.0] * 6 + [0.0] * 2], dtype=jnp.float32)

    (pi, actions) = actor.forward(action_ids, attention_mask)
    actions = jax.block_until_ready(actions)
    loc, std = pi

    # correctness vs pure-JAX f32 reference (kernel uses bf16 MXU inputs -> bf16-level tol)
    x_emb = actor.embed(action_ids)
    ref_actions = reference_last_hidden(x_emb, attention_mask, params)
    assert actions.shape == (B, D) and loc.shape == (B, D) and std.shape == (D,)
    assert jnp.allclose(actions, ref_actions, rtol=5e-3, atol=5e-3)
    assert jnp.allclose(std, jnp.exp(-0.5) * jnp.ones((D,)), rtol=1e-6, atol=1e-6)

    # get_log_prob on sampled actions (plain-JAX f32 -> tight tolerance)
    sampled = loc + std[None, :] * jax.random.normal(ks[9], (B, D), jnp.float32)
    lp = jax.block_until_ready(actor.get_log_prob(pi, sampled))
    lp_ref = jnp.sum(
        -0.5 * ((sampled - loc) / std[None, :]) ** 2
        - jnp.log(std)[None, :] - 0.5 * jnp.log(2.0 * jnp.pi), axis=-1)
    assert lp.shape == (B,)
    assert jnp.allclose(lp, lp_ref, rtol=1e-5, atol=1e-5)

    print("KERNEL_OK")
</pallas_src>

<mosaic_0001>
module attributes {stable_mosaic.version = 11 : i64} {
  func.func @decoder_last_token_kernel(%arg0: i32, %arg1: memref<2xi32, #tpu.memory_space<smem>>, %arg2: memref<16x128xf32, #tpu.memory_space<vmem>>, %arg3: memref<128x384xbf16, #tpu.memory_space<vmem>>, %arg4: memref<128x128xbf16, #tpu.memory_space<vmem>>, %arg5: memref<128x256xbf16, #tpu.memory_space<vmem>>, %arg6: memref<256x128xbf16, #tpu.memory_space<vmem>>, %arg7: memref<1x128xf32, #tpu.memory_space<vmem>>, %arg8: memref<1x128xf32, #tpu.memory_space<vmem>>, %arg9: memref<1x128xf32, #tpu.memory_space<vmem>>, %arg10: memref<1x128xf32, #tpu.memory_space<vmem>>, %arg11: memref<2x128xf32, #tpu.memory_space<vmem>>, %arg12: memref<16x128xf32, #tpu.memory_space<vmem>>) attributes {dimension_semantics = [#tpu.dimension_semantics<arbitrary>], iteration_bounds = array<i64: 1>, scalar_prefetch = 1 : i64, scratch_operands = 1 : i64, tpu.core_type = #tpu.core_type<tc>, window_params = [{pipeline_mode = #tpu.pipeline_mode<synchronous>, transform_indices = @transform_0, window_bounds = array<i64: 16, 128>}, {pipeline_mode = #tpu.pipeline_mode<synchronous>, transform_indices = @transform_1, window_bounds = array<i64: 128, 384>}, {pipeline_mode = #tpu.pipeline_mode<synchronous>, transform_indices = @transform_2, window_bounds = array<i64: 128, 128>}, {pipeline_mode = #tpu.pipeline_mode<synchronous>, transform_indices = @transform_3, window_bounds = array<i64: 128, 256>}, {pipeline_mode = #tpu.pipeline_mode<synchronous>, transform_indices = @transform_4, window_bounds = array<i64: 256, 128>}, {pipeline_mode = #tpu.pipeline_mode<synchronous>, transform_indices = @transform_5, window_bounds = array<i64: 1, 128>}, {pipeline_mode = #tpu.pipeline_mode<synchronous>, transform_indices = @transform_6, window_bounds = array<i64: 1, 128>}, {pipeline_mode = #tpu.pipeline_mode<synchronous>, transform_indices = @transform_7, window_bounds = array<i64: 1, 128>}, {pipeline_mode = #tpu.pipeline_mode<synchronous>, transform_indices = @transform_8, window_bounds = array<i64: 1, 128>}, {pipeline_mode = #tpu.pipeline_mode<synchronous>, transform_indices = @transform_9, window_bounds = array<i64: 2, 128>}]} {
    %c0 = arith.constant 0 : index
    %c0_0 = arith.constant 0 : index
    %0 = vector.load %arg2[%c0, %c0_0] : memref<16x128xf32, #tpu.memory_space<vmem>>, vector<16x128xf32>
    %c0_1 = arith.constant 0 : index
    %c0_2 = arith.constant 0 : index
    %1 = vector.load %arg7[%c0_1, %c0_2] : memref<1x128xf32, #tpu.memory_space<vmem>>, vector<1x128xf32>
    %c0_3 = arith.constant 0 : index
    %c0_4 = arith.constant 0 : index
    %2 = vector.load %arg8[%c0_3, %c0_4] : memref<1x128xf32, #tpu.memory_space<vmem>>, vector<1x128xf32>
    %cst = arith.constant dense<0.000000e+00> : vector<16xf32>
    %3 = vector.multi_reduction <add>, %0, %cst [1] : vector<16x128xf32> to vector<16xf32>
    %4 = vector.shape_cast %3 : vector<16xf32> to vector<16x1xf32>
    %cst_5 = arith.constant 1.280000e+02 : f32
    %5 = vector.broadcast %cst_5 : f32 to vector<16x1xf32>
    %6 = arith.divf %4, %5 : vector<16x1xf32>
    %7 = vector.broadcast %6 : vector<16x1xf32> to vector<16x128xf32>
    %8 = arith.subf %0, %7 : vector<16x128xf32>
    %9 = arith.mulf %8, %8 : vector<16x128xf32>
    %cst_6 = arith.constant dense<0.000000e+00> : vector<16xf32>
    %10 = vector.multi_reduction <add>, %9, %cst_6 [1] : vector<16x128xf32> to vector<16xf32>
    %11 = vector.shape_cast %10 : vector<16xf32> to vector<16x1xf32>
    %cst_7 = arith.constant 1.280000e+02 : f32
    %12 = vector.broadcast %cst_7 : f32 to vector<16x1xf32>
    %13 = arith.divf %11, %12 : vector<16x1xf32>
    %14 = vector.broadcast %6 : vector<16x1xf32> to vector<16x128xf32>
    %15 = arith.subf %0, %14 : vector<16x128xf32>
    %cst_8 = arith.constant 9.99999974E-6 : f32
    %16 = vector.broadcast %cst_8 : f32 to vector<16x1xf32>
    %17 = arith.addf %13, %16 : vector<16x1xf32>
    %18 = math.rsqrt %17 : vector<16x1xf32>
    %19 = vector.broadcast %18 : vector<16x1xf32> to vector<16x128xf32>
    %20 = arith.mulf %15, %19 : vector<16x128xf32>
    %21 = vector.broadcast %1 : vector<1x128xf32> to vector<16x128xf32>
    %22 = arith.mulf %20, %21 : vector<16x128xf32>
    %23 = vector.broadcast %2 : vector<1x128xf32> to vector<16x128xf32>
    %24 = arith.addf %22, %23 : vector<16x128xf32>
    %25 = arith.truncf %24 : vector<16x128xf32> to vector<16x128xbf16>
    %c0_9 = arith.constant 0 : index
    %c0_10 = arith.constant 0 : index
    %26 = vector.load %arg3[%c0_9, %c0_10] : memref<128x384xbf16, #tpu.memory_space<vmem>>, vector<128x384xbf16>
    %cst_11 = arith.constant dense<0.000000e+00> : vector<16x384xf32>
    %27 = tpu.matmul %25, %26, %cst_11 {dimension_numbers = #tpu.dot_dimension_numbers<[1], [0], [0], [1], [0, 0, 1, 1], [], []>} : vector<16x128xbf16>, vector<128x384xbf16>, vector<16x384xf32> -> vector<16x384xf32>
    %28 = vector.extract_strided_slice %27 {offsets = [0, 0], sizes = [16, 128], strides = [1, 1]} : vector<16x384xf32> to vector<16x128xf32>
    %29 = vector.extract_strided_slice %27 {offsets = [0, 128], sizes = [16, 128], strides = [1, 1]} : vector<16x384xf32> to vector<16x128xf32>
    %30 = vector.extract_strided_slice %27 {offsets = [0, 256], sizes = [16, 128], strides = [1, 1]} : vector<16x384xf32> to vector<16x128xf32>
    %c0_12 = arith.constant 0 : index
    %c0_13 = arith.constant 0 : index
    %31 = vector.load %arg12[%c0_12, %c0_13] : memref<16x128xf32, #tpu.memory_space<vmem>>, vector<16x128xf32>
    tpu.vector_store %arg12[%c0_12, %c0_13], %30 {strides = array<i32>} : memref<16x128xf32, #tpu.memory_space<vmem>>, vector<16x128xf32>,
    %c7 = arith.constant 7 : index
    %c0_14 = arith.constant 0 : index
    %32 = tpu.strided_load %arg12[%c7, %c0_14] {strides = array<i32: 8, 1>} : memref<16x128xf32, #tpu.memory_space<vmem>>, vector<2x128xf32>
    %33 = arith.truncf %32 : vector<2x128xf32> to vector<2x128xbf16>
    %34 = arith.truncf %28 : vector<16x128xf32> to vector<16x128xbf16>
    %cst_15 = arith.constant dense<0.000000e+00> : vector<2x16xf32>
    %35 = tpu.matmul %33, %34, %cst_15 {dimension_numbers = #tpu.dot_dimension_numbers<[1], [1], [0], [0], [0, 0, 1, 0], [], []>} : vector<2x128xbf16>, vector<16x128xbf16>, vector<2x16xf32> -> vector<2x16xf32>
    %36 = tpu.iota {dimensions = array<i32: 1>} : vector<2x16xi32>
    %37 = tpu.iota {dimensions = array<i32: 0>} : vector<2x16xi32>
    %c0_i32 = arith.constant 0 : i32
    %38 = vector.broadcast %c0_i32 : i32 to vector<2x16xi32>
    %c0_i32_16 = arith.constant 0 : i32
    %39 = vector.broadcast %c0_i32_16 : i32 to vector<2x16xi32>
    %40 = arith.cmpi eq, %37, %39 : vector<2x16xi32>
    %c0_17 = arith.constant 0 : index
    %41 = memref.load %arg1[%c0_17] : memref<2xi32, #tpu.memory_space<smem>>
    %42 = vector.broadcast %41 : i32 to vector<2x16xi32>
    %43 = arith.select %40, %42, %38 : vector<2x16xi1>, vector<2x16xi32>
    %c1_i32 = arith.constant 1 : i32
    %44 = vector.broadcast %c1_i32 : i32 to vector<2x16xi32>
    %45 = arith.cmpi eq, %37, %44 : vector<2x16xi32>
    %c1 = arith.constant 1 : index
    %46 = memref.load %arg1[%c1] : memref<2xi32, #tpu.memory_space<smem>>
    %47 = vector.broadcast %46 : i32 to vector<2x16xi32>
    %48 = arith.select %45, %47, %43 : vector<2x16xi1>, vector<2x16xi32>
    %c8_i32 = arith.constant 8 : i32
    %49 = vector.broadcast %c8_i32 : i32 to vector<2x16xi32>
    %50 = arith.muli %37, %49 : vector<2x16xi32>
    %51 = arith.cmpi sge, %36, %50 : vector<2x16xi32>
    %52 = arith.addi %50, %48 : vector<2x16xi32>
    %53 = arith.cmpi slt, %36, %52 : vector<2x16xi32>
    %54 = arith.andi %51, %53 : vector<2x16xi1>
    %cst_18 = arith.constant -1.000000e+09 : f32
    %55 = vector.broadcast %cst_18 : f32 to vector<2x16xf32>
    %56 = arith.select %54, %35, %55 : vector<2x16xi1>, vector<2x16xf32>
    %cst_19 = arith.constant dense<0xFF800000> : vector<2xf32>
    %57 = vector.multi_reduction <maximumf>, %56, %cst_19 [1] : vector<2x16xf32> to vector<2xf32>
    %58 = vector.shape_cast %57 : vector<2xf32> to vector<2x1xf32>
    %59 = vector.broadcast %58 : vector<2x1xf32> to vector<2x16xf32>
    %60 = arith.subf %56, %59 : vector<2x16xf32>
    %61 = math.exp %60 : vector<2x16xf32>
    %cst_20 = arith.constant dense<0.000000e+00> : vector<2xf32>
    %62 = vector.multi_reduction <add>, %61, %cst_20 [1] : vector<2x16xf32> to vector<2xf32>
    %63 = vector.shape_cast %62 : vector<2xf32> to vector<2x1xf32>
    %64 = tpu.reciprocal %63 {approx = true} : vector<2x1xf32> -> vector<2x1xf32>
    %65 = vector.broadcast %64 : vector<2x1xf32> to vector<2x16xf32>
    %66 = arith.mulf %61, %65 : vector<2x16xf32>
    %67 = arith.truncf %66 : vector<2x16xf32> to vector<2x16xbf16>
    %68 = arith.truncf %29 : vector<16x128xf32> to vector<16x128xbf16>
    %cst_21 = arith.constant dense<0.000000e+00> : vector<2x128xf32>
    %69 = tpu.matmul %67, %68, %cst_21 {dimension_numbers = #tpu.dot_dimension_numbers<[1], [0], [0], [1], [0, 0, 1, 1], [], []>} : vector<2x16xbf16>, vector<16x128xbf16>, vector<2x128xf32> -> vector<2x128xf32>
    %c7_22 = arith.constant 7 : index
    %c0_23 = arith.constant 0 : index
    %70 = tpu.strided_load %arg2[%c7_22, %c0_23] {strides = array<i32: 8, 1>} : memref<16x128xf32, #tpu.memory_space<vmem>>, vector<2x128xf32>
    %71 = arith.truncf %69 : vector<2x128xf32> to vector<2x128xbf16>
    %c0_24 = arith.constant 0 : index
    %c0_25 = arith.constant 0 : index
    %72 = vector.load %arg4[%c0_24, %c0_25] : memref<128x128xbf16, #tpu.memory_space<vmem>>, vector<128x128xbf16>
    %cst_26 = arith.constant dense<0.000000e+00> : vector<2x128xf32>
    %73 = tpu.matmul %71, %72, %cst_26 {dimension_numbers = #tpu.dot_dimension_numbers<[1], [0], [0], [1], [0, 0, 1, 1], [], []>} : vector<2x128xbf16>, vector<128x128xbf16>, vector<2x128xf32> -> vector<2x128xf32>
    %74 = arith.addf %70, %73 : vector<2x128xf32>
    %c0_27 = arith.constant 0 : index
    %c0_28 = arith.constant 0 : index
    %75 = vector.load %arg9[%c0_27, %c0_28] : memref<1x128xf32, #tpu.memory_space<vmem>>, vector<1x128xf32>
    %c0_29 = arith.constant 0 : index
    %c0_30 = arith.constant 0 : index
    %76 = vector.load %arg10[%c0_29, %c0_30] : memref<1x128xf32, #tpu.memory_space<vmem>>, vector<1x128xf32>
    %cst_31 = arith.constant dense<0.000000e+00> : vector<2xf32>
    %77 = vector.multi_reduction <add>, %74, %cst_31 [1] : vector<2x128xf32> to vector<2xf32>
    %78 = vector.shape_cast %77 : vector<2xf32> to vector<2x1xf32>
    %cst_32 = arith.constant 1.280000e+02 : f32
    %79 = vector.broadcast %cst_32 : f32 to vector<2x1xf32>
    %80 = arith.divf %78, %79 : vector<2x1xf32>
    %81 = vector.broadcast %80 : vector<2x1xf32> to vector<2x128xf32>
    %82 = arith.subf %74, %81 : vector<2x128xf32>
    %83 = arith.mulf %82, %82 : vector<2x128xf32>
    %cst_33 = arith.constant dense<0.000000e+00> : vector<2xf32>
    %84 = vector.multi_reduction <add>, %83, %cst_33 [1] : vector<2x128xf32> to vector<2xf32>
    %85 = vector.shape_cast %84 : vector<2xf32> to vector<2x1xf32>
    %cst_34 = arith.constant 1.280000e+02 : f32
    %86 = vector.broadcast %cst_34 : f32 to vector<2x1xf32>
    %87 = arith.divf %85, %86 : vector<2x1xf32>
    %88 = vector.broadcast %80 : vector<2x1xf32> to vector<2x128xf32>
    %89 = arith.subf %74, %88 : vector<2x128xf32>
    %cst_35 = arith.constant 9.99999974E-6 : f32
    %90 = vector.broadcast %cst_35 : f32 to vector<2x1xf32>
    %91 = arith.addf %87, %90 : vector<2x1xf32>
    %92 = math.rsqrt %91 : vector<2x1xf32>
    %93 = vector.broadcast %92 : vector<2x1xf32> to vector<2x128xf32>
    %94 = arith.mulf %89, %93 : vector<2x128xf32>
    %95 = vector.broadcast %75 : vector<1x128xf32> to vector<2x128xf32>
    %96 = arith.mulf %94, %95 : vector<2x128xf32>
    %97 = vector.broadcast %76 : vector<1x128xf32> to vector<2x128xf32>
    %98 = arith.addf %96, %97 : vector<2x128xf32>
    %99 = arith.truncf %98 : vector<2x128xf32> to vector<2x128xbf16>
    %c0_36 = arith.constant 0 : index
    %c0_37 = arith.constant 0 : index
    %100 = vector.load %arg5[%c0_36, %c0_37] : memref<128x256xbf16, #tpu.memory_space<vmem>>, vector<128x256xbf16>
    %cst_38 = arith.constant dense<0.000000e+00> : vector<2x256xf32>
    %101 = tpu.matmul %99, %100, %cst_38 {dimension_numbers = #tpu.dot_dimension_numbers<[1], [0], [0], [1], [0, 0, 1, 1], [], []>} : vector<2x128xbf16>, vector<128x256xbf16>, vector<2x256xf32> -> vector<2x256xf32>
    %102 = arith.mulf %101, %101 : vector<2x256xf32>
    %103 = arith.mulf %101, %102 : vector<2x256xf32>
    %cst_39 = arith.constant 4.471500e-02 : f32
    %104 = vector.broadcast %cst_39 : f32 to vector<2x256xf32>
    %105 = arith.mulf %104, %103 : vector<2x256xf32>
    %106 = arith.addf %101, %105 : vector<2x256xf32>
    %cst_40 = arith.constant 0.797884583 : f32
    %107 = vector.broadcast %cst_40 : f32 to vector<2x256xf32>
    %108 = arith.mulf %107, %106 : vector<2x256xf32>
    %109 = math.tanh %108 : vector<2x256xf32>
    %cst_41 = arith.constant 1.000000e+00 : f32
    %110 = vector.broadcast %cst_41 : f32 to vector<2x256xf32>
    %111 = arith.addf %110, %109 : vector<2x256xf32>
    %cst_42 = arith.constant 5.000000e-01 : f32
    %112 = vector.broadcast %cst_42 : f32 to vector<2x256xf32>
    %113 = arith.mulf %112, %111 : vector<2x256xf32>
    %114 = arith.mulf %101, %113 : vector<2x256xf32>
    %115 = arith.truncf %114 : vector<2x256xf32> to vector<2x256xbf16>
    %c0_43 = arith.constant 0 : index
    %c0_44 = arith.constant 0 : index
    %116 = vector.load %arg6[%c0_43, %c0_44] : memref<256x128xbf16, #tpu.memory_space<vmem>>, vector<256x128xbf16>
    %cst_45 = arith.constant dense<0.000000e+00> : vector<2x128xf32>
    %117 = tpu.matmul %115, %116, %cst_45 {dimension_numbers = #tpu.dot_dimension_numbers<[1], [0], [0], [1], [0, 0, 1, 1], [], []>} : vector<2x256xbf16>, vector<256x128xbf16>, vector<2x128xf32> -> vector<2x128xf32>
    %118 = arith.addf %74, %117 : vector<2x128xf32>
    %c0_46 = arith.constant 0 : index
    %c0_47 = arith.constant 0 : index
    %119 = vector.load %arg11[%c0_46, %c0_47] : memref<2x128xf32, #tpu.memory_space<vmem>>, vector<2x128xf32>
    tpu.vector_store %arg11[%c0_46, %c0_47], %118 {strides = array<i32>} : memref<2x128xf32, #tpu.memory_space<vmem>>, vector<2x128xf32>,
    return
  }
  func.func @transform_0(%arg0: i32, %arg1: memref<2xi32, #tpu.memory_space<smem>>) -> (i32, i32) {
    %c0_i32 = arith.constant 0 : i32
    %c0_i32_0 = arith.constant 0 : i32
    %c0_i32_1 = arith.constant 0 : i32
    return %c0_i32, %c0_i32_0 : i32, i32
  }
  func.func @transform_1(%arg0: i32, %arg1: memref<2xi32, #tpu.memory_space<smem>>) -> (i32, i32) {
    %c0_i32 = arith.constant 0 : i32
    %c0_i32_0 = arith.constant 0 : i32
    %c0_i32_1 = arith.constant 0 : i32
    return %c0_i32, %c0_i32_0 : i32, i32
  }
  func.func @transform_2(%arg0: i32, %arg1: memref<2xi32, #tpu.memory_space<smem>>) -> (i32, i32) {
    %c0_i32 = arith.constant 0 : i32
    %c0_i32_0 = arith.constant 0 : i32
    %c0_i32_1 = arith.constant 0 : i32
    return %c0_i32, %c0_i32_0 : i32, i32
  }
  func.func @transform_3(%arg0: i32, %arg1: memref<2xi32, #tpu.memory_space<smem>>) -> (i32, i32) {
    %c0_i32 = arith.constant 0 : i32
    %c0_i32_0 = arith.constant 0 : i32
    %c0_i32_1 = arith.constant 0 : i32
    return %c0_i32, %c0_i32_0 : i32, i32
  }
  func.func @transform_4(%arg0: i32, %arg1: memref<2xi32, #tpu.memory_space<smem>>) -> (i32, i32) {
    %c0_i32 = arith.constant 0 : i32
    %c0_i32_0 = arith.constant 0 : i32
    %c0_i32_1 = arith.constant 0 : i32
    return %c0_i32, %c0_i32_0 : i32, i32
  }
  func.func @transform_5(%arg0: i32, %arg1: memref<2xi32, #tpu.memory_space<smem>>) -> (i32, i32) {
    %c0_i32 = arith.constant 0 : i32
    %c0_i32_0 = arith.constant 0 : i32
    %c0_i32_1 = arith.constant 0 : i32
    return %c0_i32, %c0_i32_0 : i32, i32
  }
  func.func @transform_6(%arg0: i32, %arg1: memref<2xi32, #tpu.memory_space<smem>>) -> (i32, i32) {
    %c0_i32 = arith.constant 0 : i32
    %c0_i32_0 = arith.constant 0 : i32
    %c0_i32_1 = arith.constant 0 : i32
    return %c0_i32, %c0_i32_0 : i32, i32
  }
  func.func @transform_7(%arg0: i32, %arg1: memref<2xi32, #tpu.memory_space<smem>>) -> (i32, i32) {
    %c0_i32 = arith.constant 0 : i32
    %c0_i32_0 = arith.constant 0 : i32
    %c0_i32_1 = arith.constant 0 : i32
    return %c0_i32, %c0_i32_0 : i32, i32
  }
  func.func @transform_8(%arg0: i32, %arg1: memref<2xi32, #tpu.memory_space<smem>>) -> (i32, i32) {
    %c0_i32 = arith.constant 0 : i32
    %c0_i32_0 = arith.constant 0 : i32
    %c0_i32_1 = arith.constant 0 : i32
    return %c0_i32, %c0_i32_0 : i32, i32
  }
  func.func @transform_9(%arg0: i32, %arg1: memref<2xi32, #tpu.memory_space<smem>>) -> (i32, i32) {
    %c0_i32 = arith.constant 0 : i32
    %c0_i32_0 = arith.constant 0 : i32
    %c0_i32_1 = arith.constant 0 : i32
    return %c0_i32, %c0_i32_0 : i32, i32
  }
}

</mosaic_0001>

<bundles_post_ra>
// kernel: tpu_custom_call.1
= control target key start
LH: loop header
LB: loop body
LE: loop exit
PB: predicated region body
PF: predicated region fallthrough
CT: control target
= control target key end

     0   :  { %s1640_s0 = inlined_call_operand.hbm [shape: s32[2], index: 0, kind: input, shape index: {}]   ;;  %s1641_s1 = inlined_call_operand.hbm [shape: f32[16,128], index: 1, kind: input, shape index: {}]   ;;  %s1642_s2 = inlined_call_operand.hbm [shape: bf16[128,384], index: 2, kind: input, shape index: {}]   ;;  %s1643_s3 = inlined_call_operand.hbm [shape: bf16[128,128], index: 3, kind: input, shape index: {}]   ;;  %s1644_s4 = inlined_call_operand.hbm [shape: bf16[128,256], index: 4, kind: input, shape index: {}]   ;;  %s1645_s5 = inlined_call_operand.hbm [shape: bf16[256,128], index: 5, kind: input, shape index: {}]   ;;  %s1646_s6 = inlined_call_operand.vmem [shape: f32[1,128], index: 6, kind: input, shape index: {}]   ;;  %s1647_s7 = inlined_call_operand.vmem [shape: f32[1,128], index: 7, kind: input, shape index: {}]   ;;  %s1648_s8 = inlined_call_operand.vmem [shape: f32[1,128], index: 8, kind: input, shape index: {}]   ;;  %s1649_s9 = inlined_call_operand.vmem [shape: f32[1,128], index: 9, kind: input, shape index: {}]   ;;  %s1650_s10 = inlined_call_operand.hbm [shape: f32[2,128], index: 10, kind: output, shape index: {}]  }
   0x1   :  { %s1276_s15 = scalar_lea.hbm %s1640_s0, 16 }
   0x2   :  { %p1277_p0 = scmp.ne.s32.totalorder %s1640_s0, %s1276_s15  ;;  %p1280_p1 = scmp.lt.u32.totalorder %s1276_s15, %s1640_s0 }
   0x4   :  { %p1282_p2 = pnand %p1280_p1, %p1277_p0 }
   0x6   :  { %1285 = shalt.err (!%p1282_p2)  }
   0x7   :  { %s1428_s20 = smov [#allocation4]  }
   0x8   :  { %16 = dma.hbm_to_smem %s1640_s0, 16, %s1428_s20, [#allocation3] }
   0x9   :  { %1418 = dma.done.wait [#allocation3], 16 }
   0xa   :  { %1419 = vsyncadd [#allocation3], 4294967280 }
   0xb   :  { %18 = sfence }
   0xc   :  { %19 = vsyncpa [#allocation6], 0 }
   0xd   :  { %20 = vsyncpa [#allocation9], 0 }
   0xe   :  { %21 = vsyncpa [#allocation12], 0 }
   0xf   :  { %22 = vsyncpa [#allocation7], 0  ;;  %s1429_s23 = smov [#allocation8]   ;;  %s1286_s27 = scalar_lea.hbm %s1642_s2, 3072 }
  0x10   :  { %s40_s24 = sshll.u32 %s1429_s23, 4  ;;  %p1287_p3 = scmp.ne.s32.totalorder %s1642_s2, %s1286_s27  ;;  %s41_s24 = int_to_ptr.vmem [resolvable:$true] %s40_s24 }
  0x11   :  { %p1290_p4 = scmp.lt.u32.totalorder %s1286_s27, %s1642_s2 }
  0x13   :  { %p1292_p5 = pnand %p1290_p4, %p1287_p3 }
  0x15   :  { %1295 = shalt.err (!%p1292_p5)
}
  0x16   :  { %s1296_s11 = scalar_lea.vmem %s41_s24, 3072  ;;  %p1301_p7 = scmp.lt.s32.totalorder %s41_s24, %s41_s24 }
  0x17   :  { %p1297_p6 = scmp.ne.s32.totalorder %s41_s24, %s1296_s11  ;;  %p1302_p8 = scmp.lt.s32.totalorder %s1296_s11, %s1296_s11 }
  0x19   :  { %p1303_p9 = por %p1302_p8, %p1301_p7 }
  0x1b   :  { %p1304_p10 = pnand %p1303_p9, %p1297_p6 }
  0x1d   :  { %1307 = shalt.err (!%p1304_p10)
}
  0x1e   :  { %s1430_s12 = smov 192   ;;  %s1431_s13 = smov 12  }
  0x1f   :  { %46 = dma.hbm_to_vmem [thread:$0]  %s1642_s2, 3072, %s41_s24, [#allocation9], %s1430_s12, %s1430_s12, %s1431_s13  }
  0x20   :  { %s1432_s16 = smov [#allocation11]   ;;  %s1433_s18 = smov [#allocation5]  }
  0x21   :  { %s64_s17 = sshll.u32 %s1432_s16, 4  ;;  %s28_s19 = sshll.u32 %s1433_s18, 4  ;;  %s65_s17 = int_to_ptr.vmem [resolvable:$true] %s64_s17  ;;  %s29_s19 = int_to_ptr.vmem [resolvable:$true] %s28_s19 }
  0x22   :  { %s1308_s22 = scalar_lea.hbm %s1644_s4, 2048 }
  0x23   :  { %p1309_p11 = scmp.ne.s32.totalorder %s1644_s4, %s1308_s22  ;;  %p1312_p12 = scmp.lt.u32.totalorder %s1308_s22, %s1644_s4 }
  0x25   :  { %p1314_p13 = pnand %p1312_p12, %p1309_p11 }
  0x27   :  { %1317 = shalt.err (!%p1314_p13)
}
  0x28   :  { %s1318_s2 = scalar_lea.vmem %s65_s17, 2048  ;;  %p1323_p1 = scmp.lt.s32.totalorder %s65_s17, %s65_s17 }
  0x29   :  { %p1319_p0 = scmp.ne.s32.totalorder %s65_s17, %s1318_s2  ;;  %p1324_p2 = scmp.lt.s32.totalorder %s1318_s2, %s1318_s2 }
  0x2b   :  { %p1325_p3 = por %p1324_p2, %p1323_p1 }
  0x2d   :  { %p1326_p4 = pnand %p1325_p3, %p1319_p0 }
  0x2f   :  { %1329 = shalt.err (!%p1326_p4)
}
  0x30   :  { %s1434_s24 = smov 128   ;;  %s1435_s28 = smov 8  }
  0x31   :  { %70 = dma.hbm_to_vmem [thread:$0]  %s1644_s4, 2048, %s65_s17, [#allocation12], %s1434_s24, %s1434_s24, %s1435_s28  }
  0x32   :  { %s1330_s12 = scalar_lea.hbm %s1641_s1, 256 }
  0x33   :  { %p1331_p5 = scmp.ne.s32.totalorder %s1641_s1, %s1330_s12  ;;  %p1334_p6 = scmp.lt.u32.totalorder %s1330_s12, %s1641_s1 }
  0x35   :  { %p1336_p7 = pnand %p1334_p6, %p1331_p5 }
  0x37   :  { %1339 = shalt.err (!%p1336_p7)
}
  0x38   :  { %s1340_s18 = scalar_lea.vmem %s29_s19, 256  ;;  %p1345_p9 = scmp.lt.s32.totalorder %s29_s19, %s29_s19 }
  0x39   :  { %p1341_p8 = scmp.ne.s32.totalorder %s29_s19, %s1340_s18  ;;  %p1346_p10 = scmp.lt.s32.totalorder %s1340_s18, %s1340_s18 }
  0x3b   :  { %p1347_p11 = por %p1346_p10, %p1345_p9 }
  0x3d   :  { %p1348_p12 = pnand %p1347_p11, %p1341_p8 }
  0x3f   :  { %1351 = shalt.err (!%p1348_p12)
}
  0x40   :  { %34 = dma.hbm_to_vmem [thread:$0]  %s1641_s1, 256, %s29_s19, [#allocation6], %s1434_s24, %s1434_s24, %s1435_s28  }
  0x41   :  { %s1436_s20 = smov [#allocation10]   ;;  %s1352_s25 = scalar_lea.hbm %s1643_s3, 1024 }
  0x42   :  { %s52_s21 = sshll.u32 %s1436_s20, 4  ;;  %p1353_p13 = scmp.ne.s32.totalorder %s1643_s3, %s1352_s25  ;;  %s53_s21 = int_to_ptr.vmem [resolvable:$true] %s52_s21 }
  0x43   :  { %p1356_p0 = scmp.lt.u32.totalorder %s1352_s25, %s1643_s3 }
  0x45   :  { %p1358_p1 = pnand %p1356_p0, %p1353_p13 }
  0x47   :  { %1361 = shalt.err (!%p1358_p1)
}
  0x48   :  { %s1362_s30 = scalar_lea.vmem %s53_s21, 1024  ;;  %p1367_p3 = scmp.lt.s32.totalorder %s53_s21, %s53_s21 }
  0x49   :  { %p1363_p2 = scmp.ne.s32.totalorder %s53_s21, %s1362_s30  ;;  %p1368_p4 = scmp.lt.s32.totalorder %s1362_s30, %s1362_s30 }
  0x4b   :  { %p1369_p5 = por %p1368_p4, %p1367_p3 }
  0x4d   :  { %p1370_p6 = pnand %p1369_p5, %p1363_p2 }
  0x4f   :  { %1373 = shalt.err (!%p1370_p6)
}
  0x50   :  { %s1437_s1 = smov 64   ;;  %s1438_s19 = smov 4  }
  0x51   :  { %58 = dma.hbm_to_vmem [thread:$0]  %s1643_s3, 1024, %s53_s21, [#allocation9], %s1437_s1, %s1437_s1, %s1438_s19  }
  0x52   :  { %s1439_s0 = smov [#allocation13]   ;;  %s1374_s14 = scalar_lea.hbm %s1645_s5, 2048 }
  0x53   :  { %s76_s11 = sshll.u32 %s1439_s0, 4  ;;  %p1375_p7 = scmp.ne.s32.totalorder %s1645_s5, %s1374_s14  ;;  %s77_s11 = int_to_ptr.vmem [resolvable:$true] %s76_s11 }
  0x54   :  { %p1378_p8 = scmp.lt.u32.totalorder %s1374_s14, %s1645_s5 }
  0x56   :  { %p1380_p9 = pnand %p1378_p8, %p1375_p7 }
  0x58   :  { %1383 = shalt.err (!%p1380_p9)
}
  0x59   :  { %s1384_s17 = scalar_lea.vmem %s77_s11, 2048  ;;  %p1389_p11 = scmp.lt.s32.totalorder %s77_s11, %s77_s11 }
  0x5a   :  { %p1385_p10 = scmp.ne.s32.totalorder %s77_s11, %s1384_s17  ;;  %p1390_p12 = scmp.lt.s32.totalorder %s1384_s17, %s1384_s17 }
  0x5c   :  { %p1391_p13 = por %p1390_p12, %p1389_p11 }
  0x5e   :  { %p1392_p0 = pnand %p1391_p13, %p1385_p10 }
  0x60   :  { %1395 = shalt.err (!%p1392_p0)
}
  0x61   :  { %82 = dma.hbm_to_vmem [thread:$0]  %s1645_s5, 2048, %s77_s11, [#allocation12], %s1437_s1, %s1437_s1, %s1438_s19  }
  0x62   :  { %1420 = dma.done.wait [#allocation6], 256  }
  0x63   :  { %1421 = vsyncadd [#allocation6], 4294967040 }
  0x64   :  { %1422 = dma.done.wait [#allocation9], 4096  }
  0x65   :  { %1423 = vsyncadd [#allocation9], 4294963200 }
  0x66   :  { %1424 = dma.done.wait [#allocation12], 4096  }
  0x67   :  { %1425 = vsyncadd [#allocation12], 4294963200  ;;  %v107_v0 = vld [vmem:[#allocation5] sm:$0xff]  ;;  %v108_v1 = vld [vmem:[#allocation5 + $0x8] sm:$0xff]  ;;  %v1440_v4 = vmov 0.0   ;;  %v1441_v30 = vmov 0  }
  0x68   :  { %111 = vadd.xlane.f32.xlu0 %v107_v0  ;;  %v1182_v2 = vld [vmem:[#allocation8 + $0x4] ss:$12 sps:$4 sm:$0xff]   ;;  %v1184_v3 = vld [vmem:[#allocation8] ss:$12 sps:$4 sm:$0xff]   ;;  %1114 = vmatprep.subr.bf16.mxu1 %v1440_v4  ;;  %v1185_v5 = vld [vmem:[#allocation8 + $0x8] ss:$12 sps:$4 sm:$0xff]  }
  0x69   :  { %v1186_v6 = vld [vmem:[#allocation8 + $0x1c] ss:$12 sps:$4 sm:$0xff]   ;;  %311 = vmatprep.subr.bf16.mxu0 %v1182_v2  ;;  %1115 = vmatpush3.bf16.msra.mxu1 %v1185_v5  ;;  %v1188_v15 = vld [vmem:[#allocation8 + $0x18] ss:$12 sps:$4 sm:$0xff]   ;;  %v1189_v16 = vld [vmem:[#allocation8 + $0x20] ss:$12 sps:$4 sm:$0xff]  }
  0x6a   :  { %312 = vmatpush1.bf16.msra.mxu0 %v1184_v3  ;;  %1116 = vmatprep.subr.bf16.mxu1 %v1440_v4  ;;  %v1190_v17 = vld [vmem:[#allocation8 + $0x34] ss:$12 sps:$4 sm:$0xff]   ;;  %v1192_v18 = vld [vmem:[#allocation8 + $0x30] ss:$12 sps:$4 sm:$0xff]   ;;  %v1193_v19 = vld [vmem:[#allocation8 + $0x38] ss:$12 sps:$4 sm:$0xff]  }
  0x6b   :  { %313 = vmatprep.subr.bf16.mxu0 %v1186_v6  ;;  %v1194_v20 = vld [vmem:[#allocation8 + $0x4c] ss:$12 sps:$4 sm:$0xff]   ;;  %v1196_v21 = vld [vmem:[#allocation8 + $0x48] ss:$12 sps:$4 sm:$0xff]   ;;  %v1197_v22 = vld [vmem:[#allocation8 + $0x50] ss:$12 sps:$4 sm:$0xff]   ;;  %343 = vmatprep.mubr.bf16.mxu0 %v1441_v30 }
  0x6c   :  { %113 = vadd.xlane.f32.xlu0 %v108_v1  ;;  %v1198_v23 = vld [vmem:[#allocation8 + $0x64] ss:$12 sps:$4 sm:$0xff]   ;;  %v1200_v24 = vld [vmem:[#allocation8 + $0x60] ss:$12 sps:$4 sm:$0xff]   ;;  %v1201_v25 = vld [vmem:[#allocation8 + $0x68] ss:$12 sps:$4 sm:$0xff]  }
  0x6d   :  { %1117 = vmatpush3.bf16.msra.mxu1 %v1189_v16  ;;  %v1202_v26 = vld [vmem:[#allocation8 + $0x7c] ss:$12 sps:$4 sm:$0xff]   ;;  %v1204_v27 = vld [vmem:[#allocation8 + $0x78] ss:$12 sps:$4 sm:$0xff]   ;;  %v1205_v28 = vld [vmem:[#allocation8 + $0x80] ss:$12 sps:$4 sm:$0xff]  }
  0x6e   :  { %314 = vmatpush1.bf16.msra.mxu0 %v1188_v15  ;;  %1118 = vmatprep.subr.bf16.mxu1 %v1440_v4  ;;  %v1206_v29 = vld [vmem:[#allocation8 + $0x94] ss:$12 sps:$4 sm:$0xff]   ;;  %vm1442_vm0 = vmmov 0   ;;  %v1208_v31 = vld [vmem:[#allocation8 + $0x90] ss:$12 sps:$4 sm:$0xff]   ;;  %vm459_vm6 = vcmask 123904  }
  0x6f   :  { %315 = vmatprep.subr.bf16.mxu0 %v1190_v17  ;;  %1130 = vmatprep.mubr.msk.bf16.mxu1 %vm1442_vm0, %v1440_v4  ;;  %v1209_v32 = vld [vmem:[#allocation8 + $0x98] ss:$12 sps:$4 sm:$0xff]   ;;  %v1212_v34 = vld [vmem:[#allocation8 + $0xa8] ss:$12 sps:$4 sm:$0xff]   ;;  %v1213_v35 = vld [vmem:[#allocation8 + $0xb0] ss:$12 sps:$4 sm:$0xff]  }
  0x70   :  { %v1210_v33 = vld [vmem:[#allocation8 + $0xac] ss:$12 sps:$4 sm:$0xff]   ;;  %v1000_v44 = vld [vmem:[%s1646_s6] ss:$0 sm:$0xff]  ;;  %s446_s6 = sld [smem:[#allocation4]]  ;;  %vm473_vm7 = vcmask 130048  }
  0x71   :  { %1119 = vmatpush3.bf16.msra.mxu1 %v1193_v19  ;;  %v1001_v48 = vld [vmem:[%s1647_s7] ss:$0 sm:$0xff]  ;;  %s1026_s7 = sld [smem:[#allocation4 + $0x1]]  ;;  %vm627_vm8 = vcmask 1041408  }
  0x72   :  { %316 = vmatpush1.bf16.msra.mxu0 %v1192_v18  ;;  %1120 = vmatprep.subr.bf16.mxu1 %v1440_v4 }
  0x73   :  { %317 = vmatprep.subr.bf16.mxu0 %v1194_v20 }
  0x75   :  { %1121 = vmatpush3.bf16.msra.mxu1 %v1197_v22  ;;  %v1214_v22 = vld [vmem:[#allocation10] sm:$0xff]  }
  0x76   :  { %318 = vmatpush1.bf16.msra.mxu0 %v1196_v21  ;;  %1122 = vmatprep.subr.bf16.mxu1 %v1440_v4  ;;  %v447_v3 = vstv %s446_s6 }
  0x77   :  { %319 = vmatprep.subr.bf16.mxu0 %v1198_v23  ;;  %v451_v6 = vstv %s1026_s7  ;;  %v1215_v23 = vld [vmem:[#allocation10 + $0x8] sm:$0xff]  }
  0x79   :  { %1123 = vmatpush3.bf16.msra.mxu1 %v1201_v25  ;;  %v1217_v25 = vld [vmem:[#allocation10 + $0x18] sm:$0xff]  }
  0x7a   :  { %320 = vmatpush1.bf16.msra.mxu0 %v1200_v24  ;;  %1124 = vmatprep.subr.bf16.mxu1 %v1440_v4  ;;  %v1216_v24 = vld [vmem:[#allocation10 + $0x10] sm:$0xff]  }
  0x7b   :  { %321 = vmatprep.subr.bf16.mxu0 %v1202_v26  ;;  %v1218_v26 = vld [vmem:[#allocation10 + $0x20] sm:$0xff]  }
  0x7d   :  { %1125 = vmatpush3.bf16.msra.mxu1 %v1205_v28  ;;  %v1220_v28 = vld [vmem:[#allocation10 + $0x30] sm:$0xff]  }
  0x7e   :  { %322 = vmatpush1.bf16.msra.mxu0 %v1204_v27  ;;  %1126 = vmatprep.subr.bf16.mxu1 %v1440_v4  ;;  %v1219_v27 = vld [vmem:[#allocation10 + $0x28] sm:$0xff]  }
  0x7f   :  { %323 = vmatprep.subr.bf16.mxu0 %v1206_v29 }
  0x81   :  { %1127 = vmatpush3.bf16.msra.mxu1 %v1209_v32 }
  0x82   :  { %324 = vmatpush1.bf16.msra.mxu0 %v1208_v31  ;;  %1128 = vmatprep.subr.bf16.mxu1 %v1440_v4 }
  0x83   :  { %325 = vmatprep.subr.bf16.mxu0 %v1210_v33 }
  0x85   :  { %1129 = vmatpush3.bf16.msra.mxu1 %v1213_v35 }
  0x86   :  { %326 = vmatpush1.bf16.msra.mxu0 %v1212_v34  ;;  %1134 = vmatprep.subr.bf16.mxu1 %v1440_v4  ;;  %v1221_v34 = vld [vmem:[#allocation10 + $0x38] sm:$0xff]  }
  0x87   :  { %1146 = vmatprep.subr.bf16.mxu0 %v1440_v4 }
  0xf5   :  { %v112_v7 = vpop.xlane.xlu0 %111 }
  0xf6   :  { %v116_v8 = vmul.f32 0.0078125, %v112_v7 }
  0xf8   :  { %v1573_v9 = vsub.f32 %v107_v0, %v116_v8 }
  0xf9   :  { %v114_v10 = vpop.xlane.xlu0 %113 }
  0xfa   :  { %v117_v11 = vmul.f32 0.0078125, %v114_v10  ;;  %v120_v12 = vmul.f32 %v1573_v9, %v1573_v9 }
  0xfc   :  { %v1577_v13 = vsub.f32 %v108_v1, %v117_v11  ;;  %122 = vadd.xlane.f32.xlu1 %v120_v12  ;;  %v441_v1 = vlaneseq }
  0xfe   :  { %v121_v14 = vmul.f32 %v1577_v13, %v1577_v13  ;;  %v444_v2 = vshrl.u32 %v441_v1, 7 }
 0x100   :  { %124 = vadd.xlane.f32.xlu1 %v121_v14  ;;  %vm445_vm1 = vcmp.eq.s32.totalorder %v444_v2, 0  ;;  %vm449_vm2 = vcmp.eq.s32.totalorder %v444_v2, 1  ;;  %v453_v7 = vmul.u32 8, %v444_v2 }
 0x101   :  { %v448_v5 = vsel %vm445_vm1, %v447_v3, 0 }
 0x102   :  { %v452_v8 = vsel %vm449_vm2, %v451_v6, %v448_v5 }
 0x103   :  { %v455_v10 = vadd.s32 %v453_v7, %v452_v8 }
 0x189   :  { %v123_v36 = vpop.xlane.xlu1 %122 }
 0x18a   :  { %v126_v37 = vmul.f32 0.0078125, %v123_v36 }
 0x18c   :  { %v128_v38 = vadd.f32 1e-05, %v126_v37 }
 0x18d   :  { %v125_v39 = vpop.xlane.xlu1 %124 }
 0x18e   :  { %1262 = vrsqrt.f32 %v128_v38  ;;  %v127_v40 = vmul.f32 0.0078125, %v125_v39 }
 0x190   :  { %v129_v41 = vadd.f32 1e-05, %v127_v40  ;;  %v518_v40 = vld [vmem:[#allocation5 + $0x7] ss:$8 sm:$0x3] }
 0x192   :  { %1264 = vrsqrt.f32 %v129_v41 }
 0x198   :  { %v1263_v42 = vpop.eup %1262 }
 0x199   :  { %v132_v43 = vmul.f32 %v1263_v42, %v1573_v9  ;;  %v442_v9 = vand.u32 127, %v441_v1  ;;  %v1243_v1 = vld [vmem:[#allocation11 + $0x70] ss:$8 sps:$4 sm:$0xff]  }
 0x19b   :  { %v140_v47 = vmul.f32 %v1000_v44, %v132_v43  ;;  %vm454_vm3 = vcmp.ge.s32.totalorder %v442_v9, %v453_v7  ;;  %vm456_vm4 = vcmp.lt.s32.totalorder %v442_v9, %v455_v10  ;;  %v1036_v7 = vld [vmem:[%s1648_s8] ss:$0 sm:$0xff]  ;;  %s1443_s8 = smov [#allocation14]  }
 0x19c   :  { %v1265_v45 = vpop.eup %1264  ;;  %vm457_vm5 = vmand %vm454_vm3, %vm456_vm4  ;;  %v1037_v9 = vld [vmem:[%s1649_s9] ss:$0 sm:$0xff]  ;;  %s989_s9 = sshll.u32 %s1443_s8, 4  ;;  %s990_s9 = int_to_ptr.vmem [resolvable:$true] %s989_s9 }
 0x19d   :  { %v133_v46 = vmul.f32 %v1265_v45, %v1577_v13  ;;  %v148_v50 = vadd.f32 %v1001_v48, %v140_v47  ;;  %v1227_v47 = vld [vmem:[#allocation11 + $0x14] ss:$8 sps:$4 sm:$0xff]   ;;  %s1396_s29 = scalar_lea.vmem %s990_s9, 32  ;;  %p1401_p2 = scmp.lt.s32.totalorder %s990_s9, %s990_s9 }
 0x19e   :  { %p1397_p1 = scmp.ne.s32.totalorder %s990_s9, %s1396_s29  ;;  %p1402_p3 = scmp.lt.s32.totalorder %s1396_s29, %s1396_s29 }
 0x19f   :  { %v141_v49 = vmul.f32 %v1000_v44, %v133_v46  ;;  %v1224_v46 = vld [vmem:[#allocation11 + $0x4] ss:$8 sps:$4 sm:$0xff]  }
 0x1a0   :  { %p1403_p4 = por %p1402_p3, %p1401_p2 }
 0x1a1   :  { %v149_v51 = vadd.f32 %v1001_v48, %v141_v49  ;;  %v1225_v48 = vld [vmem:[#allocation11 + $0x10] ss:$8 sps:$4 sm:$0xff]   ;;  %v1230_v49 = vld [vmem:[#allocation11 + $0x24] ss:$8 sps:$4 sm:$0xff]  }
 0x1a2   :  { %p1404_p5 = pnand %p1403_p4, %p1397_p1 }
 0x1a3   :  { %v150_v52 = vpack.c.bf16 %v149_v51, %v148_v50  ;;  %v1228_v50 = vld [vmem:[#allocation11 + $0x20] ss:$8 sps:$4 sm:$0xff]  }
 0x1a5   :  { %344 = vmatmul.mubr.bf16.vlgmr.msra.gmra.mrb[0].mxu0 %v150_v52  ;;  %1131 = vmatmul.mubr.bf16.vlgmr.msra.gmra.mrb[0].mxu1 %v150_v52 }
 0x1a6   :  { %1136 = vmatprep.mubr.msk.bf16.mxu1 %vm1442_vm0, %v1440_v4  ;;  %1162 = vmatprep.mubr.msk.bf16.mxu0 %vm1442_vm0, %v1440_v4 }
 0x1a7   :  { %1147 = vmatpush3.bf16.msra.mxu0 %v1214_v22  ;;  %v1255_v22 = vld [vmem:[#allocation13 + $0x20] sm:$0xff]  }
 0x1a8   :  { %1148 = vmatprep.subr.bf16.mxu0 %v1440_v4 }
 0x1ab   :  { %1149 = vmatpush3.bf16.msra.mxu0 %v1215_v23  ;;  %v1256_v23 = vld [vmem:[#allocation13 + $0x68] sm:$0xff]  }
 0x1ac   :  { %1150 = vmatprep.subr.bf16.mxu0 %v1440_v4 }
 0x1af   :  { %1151 = vmatpush3.bf16.msra.mxu0 %v1216_v24  ;;  %v1257_v24 = vld [vmem:[#allocation13 + $0x28] sm:$0xff]  }
 0x1b0   :  { %1152 = vmatprep.subr.bf16.mxu0 %v1440_v4 }
 0x1b3   :  { %1153 = vmatpush3.bf16.msra.mxu0 %v1217_v25  ;;  %v1258_v25 = vld [vmem:[#allocation13 + $0x70] sm:$0xff]  }
 0x1b4   :  { %1154 = vmatprep.subr.bf16.mxu0 %v1440_v4 }
 0x1b7   :  { %1155 = vmatpush3.bf16.msra.mxu0 %v1218_v26  ;;  %v1259_v26 = vld [vmem:[#allocation13 + $0x30] sm:$0xff]  }
 0x1b8   :  { %1156 = vmatprep.subr.bf16.mxu0 %v1440_v4 }
 0x1bb   :  { %1157 = vmatpush3.bf16.msra.mxu0 %v1219_v27  ;;  %v1260_v27 = vld [vmem:[#allocation13 + $0x78] sm:$0xff]  }
 0x1bc   :  { %1158 = vmatprep.subr.bf16.mxu0 %v1440_v4 }
 0x1bf   :  { %1159 = vmatpush3.bf16.msra.mxu0 %v1220_v28  ;;  %v1261_v28 = vld [vmem:[#allocation13 + $0x38] sm:$0xff]  }
 0x1c0   :  { %1160 = vmatprep.subr.bf16.mxu0 %v1440_v4 }
 0x1c3   :  { %1161 = vmatpush3.bf16.msra.mxu0 %v1221_v34 }
 0x278   :  { %v345_v53 = vpop.f32.mrb[0].mxu0  ;;  %v388_v54 = vpop.f32.mrb[0].mxu1 }
 0x279   :  { %395 = vst [vmem:[#allocation2] sm:$0xff] %v388_v54  ;;  %v347_v55 = vpop.f32.mrb[1].mxu0  ;;  %v1132_v56 = vpop.f32.mrb[1].mxu1 }
 0x27a   :  { %v349_v57 = vpop.f32.mrb[2].mxu0  ;;  %v391_v58 = vpop.f32.mrb[2].mxu1  ;;  %v1233_v56 = vld [vmem:[#allocation11 + $0x34] ss:$8 sps:$4 sm:$0xff]  }
 0x27b   :  { %v400_v59 = vpack.c.bf16 %v349_v57, %v345_v53  ;;  %396 = vst [vmem:[#allocation2 + $0x8] sm:$0xff] %v391_v58  ;;  %v351_v60 = vpop.f32.mrb[3].mxu0  ;;  %v1133_v61 = vpop.f32.mrb[3].mxu1  ;;  %v1231_v57 = vld [vmem:[#allocation11 + $0x30] ss:$8 sps:$4 sm:$0xff]  }
 0x27c   :  { %v472_v62 = vpack.c.bf16 %v351_v60, %v347_v55  ;;  %v1236_v58 = vld [vmem:[#allocation11 + $0x44] ss:$8 sps:$4 sm:$0xff]   ;;  %v1239_v60 = vld [vmem:[#allocation11 + $0x54] ss:$8 sps:$4 sm:$0xff]   ;;  %v1237_v61 = vld [vmem:[#allocation11 + $0x50] ss:$8 sps:$4 sm:$0xff]  }
 0x27d   :  { %1135 = vmatpush3.bf16.xpose.msra.mxu1 %v400_v59  ;;  %v1234_v59 = vld [vmem:[#allocation11 + $0x40] ss:$8 sps:$4 sm:$0xff]  }
 0x27e   :  { %1140 = vmatprep.subr.bf16.mxu1 %v1440_v4 }
 0x282   :  { %v398_v63 = vld [vmem:[#allocation2 + $0x7] ss:$8 sm:$0x3] }
 0x283   :  { %v399_v0 = vpack.c.bf16 %v398_v63, %v398_v63  ;;  %v1240_v63 = vld [vmem:[#allocation11 + $0x60] ss:$8 sps:$4 sm:$0xff]  }
 0x285   :  { %1137 = vmatmul.mubr.bf16.vlgmr.msra.gmra.mrb[4].mxu1 %v399_v0  ;;  %v1245_v0 = vld [vmem:[#allocation11 + $0x74] ss:$8 sps:$4 sm:$0xff]  }
 0x286   :  { %1141 = vmatpush3.bf16.msra.mxu1 %v472_v62  ;;  %1142 = vmatprep.mubr.msk.bf16.mxu1 %vm1442_vm0, %v1440_v4  ;;  %v1242_v62 = vld [vmem:[#allocation11 + $0x64] ss:$8 sps:$4 sm:$0xff]  }
 0x287   :  { %752 = vmatprep.subr.bf16.mxu1 %v1224_v46 }
 0x358   :  { %v435_v11 = vpop.f32.mrb[4].mxu1 }
 0x359   :  { %v458_v12 = vsel %vm457_vm5, %v435_v11, -1e+09  ;;  %v1138_v13 = vpop.f32.mrb[5].mxu1 }
 0x35a   :  { %v438_v14 = vpop.f32.mrb[6].mxu1  ;;  %v460_v15 = vsel %vm459_vm6, %v458_v12, -inf  ;;  %v1246_v13 = vld [vmem:[#allocation13 + $0x40] sm:$0xff]  }
 0x35b   :  { %461 = vmax.xlane.f32.xlu0 %v460_v15  ;;  %v1139_v16 = vpop.f32.mrb[7].mxu1  ;;  %v1247_v14 = vld [vmem:[#allocation13] sm:$0xff]   ;;  %1092 = vmatprep.subr.bf16.mxu0 %v1246_v13  ;;  %v1248_v15 = vld [vmem:[#allocation13 + $0x48] sm:$0xff]  }
 0x35c   :  { %v1249_v16 = vld [vmem:[#allocation13 + $0x8] sm:$0xff]  }
 0x3e8   :  { %v462_v17 = vpop.xlane.xlu0 %461 }
 0x3e9   :  { %v463_v18 = vsub.f32 %v458_v12, %v462_v17  ;;  %v1250_v17 = vld [vmem:[#allocation13 + $0x50] sm:$0xff]  }
 0x3eb   :  { %v464_v19 = vmul.f32 1.442695, %v463_v18  ;;  %v1251_v18 = vld [vmem:[#allocation13 + $0x10] sm:$0xff]  }
 0x3ed   :  { %1266 = vpow2.f32 %v464_v19  ;;  %v1252_v19 = vld [vmem:[#allocation13 + $0x58] sm:$0xff]  }
 0x3f7   :  { %v1267_v20 = vpop.eup %1266 }
 0x3f8   :  { %v466_v21 = vsel %vm459_vm6, %v1267_v20, 0.0 }
 0x3f9   :  { %467 = vadd.xlane.f32.xlu1 %v466_v21  ;;  %v1254_v21 = vld [vmem:[#allocation13 + $0x60] sm:$0xff]  }
 0x486   :  { %v468_v29 = vpop.xlane.xlu1 %467 }
 0x487   :  { %1268 = vrcp.f32 %v468_v29 }
 0x491   :  { %v1269_v31 = vpop.eup %1268 }
 0x492   :  { %v470_v32 = vmul.f32 %v1269_v31, %v1267_v20  ;;  %v1253_v20 = vld [vmem:[#allocation13 + $0x18] sm:$0xff]  }
 0x494   :  { %v471_v33 = vpack.c.bf16 %v470_v32, %v470_v32 }
 0x496   :  { %1143 = vmatmul.mubr.msk.bf16.vlgmr.msra.gmra.mrb[8].mxu1 %vm473_vm7, %v471_v33 }
 0x497   :  { %784 = vmatprep.mubr.bf16.mxu1 %v1441_v30  ;;  %v1222_v30 = vld [vmem:[#allocation11] ss:$8 sps:$4 sm:$0xff]  }
 0x498   :  { %753 = vmatpush1.bf16.msra.mxu1 %v1222_v30 }
 0x499   :  { %754 = vmatprep.subr.bf16.mxu1 %v1227_v47 }
 0x49c   :  { %755 = vmatpush1.bf16.msra.mxu1 %v1225_v48 }
 0x49d   :  { %756 = vmatprep.subr.bf16.mxu1 %v1230_v49 }
 0x4a0   :  { %757 = vmatpush1.bf16.msra.mxu1 %v1228_v50 }
 0x4a1   :  { %758 = vmatprep.subr.bf16.mxu1 %v1233_v56 }
 0x4a4   :  { %759 = vmatpush1.bf16.msra.mxu1 %v1231_v57 }
 0x4a5   :  { %760 = vmatprep.subr.bf16.mxu1 %v1236_v58 }
 0x4a8   :  { %761 = vmatpush1.bf16.msra.mxu1 %v1234_v59 }
 0x4a9   :  { %762 = vmatprep.subr.bf16.mxu1 %v1239_v60 }
 0x4ac   :  { %763 = vmatpush1.bf16.msra.mxu1 %v1237_v61 }
 0x4ad   :  { %764 = vmatprep.subr.bf16.mxu1 %v1242_v62 }
 0x4b0   :  { %765 = vmatpush1.bf16.msra.mxu1 %v1240_v63 }
 0x4b1   :  { %766 = vmatprep.subr.bf16.mxu1 %v1245_v0 }
 0x4b4   :  { %767 = vmatpush1.bf16.msra.mxu1 %v1243_v1 }
 0x569   :  { %v511_v35 = vpop.f32.mrb[8].mxu1 }
 0x56a   :  { %v519_v36 = vpack.c.bf16 %v511_v35, %v511_v35  ;;  %v1144_v37 = vpop.f32.mrb[9].mxu1 }
 0x56b   :  { %v514_v38 = vpop.f32.mrb[10].mxu1 }
 0x56c   :  { %v1145_v39 = vpop.f32.mrb[11].mxu1  ;;  %1163 = vmatmul.mubr.bf16.vlgmr.msra.gmra.mrb[4].mxu0 %v519_v36 }
 0x56d   :  { %1093 = vmatpush3.bf16.msra.mxu0 %v1247_v14 }
 0x56e   :  { %1094 = vmatprep.subr.bf16.mxu0 %v1248_v15 }
 0x571   :  { %1095 = vmatpush3.bf16.msra.mxu0 %v1249_v16 }
 0x572   :  { %1096 = vmatprep.subr.bf16.mxu0 %v1250_v17 }
 0x575   :  { %1097 = vmatpush3.bf16.msra.mxu0 %v1251_v18 }
 0x576   :  { %1098 = vmatprep.subr.bf16.mxu0 %v1252_v19 }
 0x579   :  { %1099 = vmatpush3.bf16.msra.mxu0 %v1253_v20 }
 0x57a   :  { %1100 = vmatprep.subr.bf16.mxu0 %v1254_v21 }
 0x57d   :  { %1101 = vmatpush3.bf16.msra.mxu0 %v1255_v22 }
 0x57e   :  { %1102 = vmatprep.subr.bf16.mxu0 %v1256_v23 }
 0x581   :  { %1103 = vmatpush3.bf16.msra.mxu0 %v1257_v24 }
 0x582   :  { %1104 = vmatprep.subr.bf16.mxu0 %v1258_v25 }
 0x585   :  { %1105 = vmatpush3.bf16.msra.mxu0 %v1259_v26 }
 0x586   :  { %1106 = vmatprep.subr.bf16.mxu0 %v1260_v27 }
 0x589   :  { %1107 = vmatpush3.bf16.msra.mxu0 %v1261_v28 }
 0x63f   :  { %v618_v41 = vpop.f32.mrb[4].mxu0 }
 0x640   :  { %v1615_v4 = vadd.f32 %v618_v41, %v518_v40  ;;  %v1164_v42 = vpop.f32.mrb[5].mxu0 }
 0x641   :  { %v621_v43 = vpop.f32.mrb[6].mxu0 }
 0x642   :  { %v1165_v44 = vpop.f32.mrb[7].mxu0  ;;  %v628_v45 = vsel %vm627_vm8, %v1615_v4, 0.0 }
 0x643   :  { %629 = vadd.xlane.f32.xlu0 %v628_v45 }
 0x6d0   :  { %v630_v51 = vpop.xlane.xlu0 %629 }
 0x6d1   :  { %v631_v52 = vmul.f32 0.0078125, %v630_v51 }
 0x6d3   :  { %v632_v53 = vsub.f32 %v1615_v4, %v631_v52 }
 0x6d5   :  { %v633_v54 = vmul.f32 %v632_v53, %v632_v53 }
 0x6d7   :  { %v634_v55 = vsel %vm627_vm8, %v633_v54, 0.0 }
 0x6d8   :  { %635 = vadd.xlane.f32.xlu1 %v634_v55 }
 0x765   :  { %v636_v2 = vpop.xlane.xlu1 %635 }
 0x766   :  { %v637_v3 = vmul.f32 0.0078125, %v636_v2 }
 0x768   :  { %v638_v5 = vadd.f32 1e-05, %v637_v3 }
 0x76a   :  { %1270 = vrsqrt.f32 %v638_v5 }
 0x774   :  { %v1271_v6 = vpop.eup %1270 }
 0x775   :  { %v640_v8 = vmul.f32 %v1271_v6, %v632_v53 }
 0x777   :  { %v647_v10 = vmul.f32 %v1036_v7, %v640_v8 }
 0x779   :  { %v654_v11 = vadd.f32 %v1037_v9, %v647_v10 }
 0x77b   :  { %v655_v12 = vpack.c.bf16 %v654_v11, %v654_v11 }
 0x77d   :  { %785 = vmatmul.mubr.bf16.vlgmr.msra.gmra.mrb[12].mxu1 %v655_v12 }
 0x850   :  { %v786_v29 = vpop.f32.mrb[12].mxu1 }
 0x851   :  { %v793_v31 = vmul.f32 %v786_v29, %v786_v29  ;;  %v788_v32 = vpop.f32.mrb[13].mxu1 }
 0x852   :  { %v794_v33 = vmul.f32 %v788_v32, %v788_v32  ;;  %v790_v34 = vpop.f32.mrb[14].mxu1 }
 0x853   :  { %v795_v35 = vmul.f32 %v793_v31, %v786_v29  ;;  %v791_v36 = vpop.f32.mrb[15].mxu1 }
 0x854   :  { %v796_v37 = vmul.f32 %v794_v33, %v788_v32 }
 0x855   :  { %v797_v38 = vmul.f32 0.044715, %v795_v35 }
 0x856   :  { %v798_v39 = vmul.f32 0.044715, %v796_v37 }
 0x857   :  { %v799_v40 = vadd.f32 %v797_v38, %v786_v29 }
 0x858   :  { %v800_v41 = vadd.f32 %v798_v39, %v788_v32 }
 0x859   :  { %v801_v42 = vmul.f32 0.7978846, %v799_v40 }
 0x85a   :  { %v802_v43 = vmul.f32 0.7978846, %v800_v41 }
 0x85b   :  { %1272 = vtanh.f32 %v801_v42 }
 0x85c   :  { %1274 = vtanh.f32 %v802_v43 }
 0x865   :  { %v1273_v44 = vpop.eup %1272 }
 0x866   :  { %v1275_v45 = vpop.eup %1274  ;;  %v805_v30 = vadd.f32 1.0, %v1273_v44 }
 0x867   :  { %v806_v46 = vadd.f32 1.0, %v1275_v45 }
 0x868   :  { %v807_v47 = vmul.f32 0.5, %v805_v30 }
 0x869   :  { %v808_v48 = vmul.f32 0.5, %v806_v46 }
 0x86a   :  { %v809_v49 = vmul.f32 %v807_v47, %v786_v29 }
 0x86b   :  { %v810_v50 = vmul.f32 %v808_v48, %v788_v32 }
 0x86c   :  { %v811_v52 = vpack.c.bf16 %v809_v49, %v809_v49 }
 0x86d   :  { %v812_v51 = vpack.c.bf16 %v810_v50, %v810_v50 }
 0x86f   :  { %973 = vmatprep.mubr.bf16.mxu0 %v812_v51 }
 0x870   :  { %974 = vmatmul.mubr.bf16.vlgmr.msra.gmra.mrb[8].mxu0 %v811_v52 }
 0x943   :  { %v1108_v53 = vpop.f32.mrb[8].mxu0 }
 0x944   :  { %v1109_v54 = vpop.f32.mrb[9].mxu0 }
 0x945   :  { %v1110_v55 = vadd.f32 %v1109_v54, %v1108_v53  ;;  %v1111_v56 = vpop.f32.mrb[10].mxu0 }
 0x946   :  { %v1112_v57 = vpop.f32.mrb[11].mxu0 }
 0x947   :  { %v981_v58 = vadd.f32 %v1110_v55, %v1615_v4 }
 0x949   :  { %982 = vst [vmem:[#allocation14] sm:$0x3] %v981_v58 }
 0x94a   :  { %1407 = shalt.err (!%p1404_p5)
}
 0x94b   :  { %s1408_s19 = scalar_lea.hbm %s1650_s10, 32 }
 0x94c   :  { %p1409_p6 = scmp.ne.s32.totalorder %s1650_s10, %s1408_s19  ;;  %p1412_p7 = scmp.lt.u32.totalorder %s1408_s19, %s1650_s10 }
 0x94e   :  { %p1414_p8 = pnand %p1412_p7, %p1409_p6 }
 0x950   :  { %1417 = shalt.err (!%p1414_p8)
}
 0x951   :  { %992 = dma.vmem_to_hbm [thread:$0]  %s990_s9, 32, %s1650_s10, [#allocation7]  }
 0x952   :  { %1426 = dma.done.wait [#allocation7], 32  }
 0x953   :  { %1427 = vsyncadd [#allocation7], 4294967264 }
 0x954   :  { %996 = vsyncpa [#allocation6], 1 }
 0x955   :  { %997 = vsyncpa [#allocation9], 1 }
 0x956   :  { %998 = vsyncpa [#allocation12], 1 }
 0x957   :  { %999 = vsyncpa [#allocation7], 1 }

</bundles_post_ra>
